<compile_context>
chip_gen: v7x
topology: tpu7x:2x2x1
jax: 0.10.0
libtpu: 0.0.40
codegen_flags: <defaults>
</compile_context>

<pallas_src>
import functools

import jax
import jax.numpy as jnp
from jax.experimental import pallas as pl
from jax.experimental.pallas import tpu as pltpu


# ----------------------------- static "config" ------------------------------
OHEM = True            # mirrors config.OHEM
RPN_TOTAL_NUM = 256    # mirrors config.RPN_TOTAL_NUM

_NEG_SENTINEL = -1.0   # CE losses are >= 0, so -1 marks "not a kept negative"
_LANES = 512           # lane-dense tile width (multiple of 128)
_MAX_TILE_ROWS = 512   # up to (512, 512) f32 per logit plane per grid step


def _round_up(a, b):
    return ((a + b - 1) // b) * b


def _cdiv(a, b):
    return (a + b - 1) // b


def _choose_rows(n):
    """Pick (padded_rows, tile_rows) for n anchors packed LANES per row.

    tile_rows is always a multiple of 32 (int8 label tiling) and we try to
    keep grid >= 2 for megacore sharding once the problem is big enough.
    """
    rows_needed = max(1, _cdiv(n, _LANES))
    if rows_needed <= 64:
        tile_rows = _round_up(rows_needed, 32)          # single small tile
    elif rows_needed <= 2 * _MAX_TILE_ROWS:
        tile_rows = _round_up(_cdiv(rows_needed, 2), 32)  # 2 tiles (v7x: 2 TCs)
    else:
        tile_rows = _MAX_TILE_ROWS
    rows = _round_up(rows_needed, tile_rows)
    return rows, tile_rows


# ------------------------------ Pallas kernel --------------------------------

def _rpn_cls_loss_kernel(logits_ref, lbl_ref, negloss_ref, part_ref):
    """Per-anchor 2-class cross-entropy + masked partial reductions.

    logits_ref  : (2, TILE_ROWS, LANES) f32  [0]=class-0 logits, [1]=class-1
    lbl_ref     : (TILE_ROWS, LANES)    i8   labels in {-1, 0, 1} (-1 = ignore/pad)
    negloss_ref : (TILE_ROWS, LANES)    f32  loss where label==0 else sentinel
    part_ref    : (8, 128)              f32  per-tile partials broadcast by row:
                  row0=pos_loss_sum row1=pos_count row2=valid_loss_sum row3=valid_count
    """
    l0 = logits_ref[0]
    l1 = logits_ref[1]
    lbl = lbl_ref[...].astype(jnp.int32)     # i8 -> i32 promote on the VPU (free)

    is_pos = lbl == 1
    is_neg = lbl == 0

    # 2-class CE in softplus form: CE = softplus(l_other - l_target)
    d = jnp.where(is_pos, l0 - l1, l1 - l0)
    loss = jnp.maximum(d, 0.0) + jnp.log1p(jnp.exp(-jnp.abs(d)))   # >= 0

    posf = is_pos.astype(jnp.float32)
    valf = posf + is_neg.astype(jnp.float32)

    # lane-dense per-anchor output consumed by the OHEM top-k (done in glue)
    negloss_ref[...] = jnp.where(is_neg, loss, _NEG_SENTINEL)

    # in-kernel reductions keep the scalar path's HBM writeback tiny
    pos_sum = jnp.sum(loss * posf)
    pos_cnt = jnp.sum(posf)
    val_sum = jnp.sum(loss * valf)
    val_cnt = jnp.sum(valf)

    row = jax.lax.broadcasted_iota(jnp.int32, part_ref.shape, 0)
    part_ref[...] = jnp.where(
        row == 0, pos_sum,
        jnp.where(row == 1, pos_cnt,
                  jnp.where(row == 2, val_sum,
                            jnp.where(row == 3, val_cnt, 0.0))))


# ------------------------------ kernel wrapper --------------------------------

def _ce_parts(logits, labels):
    """Run the Pallas CE kernel.

    logits: (N, 2) f32, labels: (N,) int-like in {-1, 0, 1}.
    Returns (neg_loss_padded_2d, pos_sum, pos_cnt, valid_sum, valid_cnt).
    """
    n = logits.shape[0]
    rows, tile_rows = _choose_rows(n)
    n_pad = rows * _LANES
    grid = rows // tile_rows
    pad = n_pad - n

    # Single pre-transposed logits slab (2, rows, LANES); labels as int8.
    lg = jnp.pad(logits.astype(jnp.float32).T, ((0, 0), (0, pad)))
    lg = lg.reshape(2, rows, _LANES)
    lbl = jnp.pad(labels.astype(jnp.int8), (0, pad), constant_values=-1)
    lbl = lbl.reshape(rows, _LANES)

    negloss, parts = pl.pallas_call(
        _rpn_cls_loss_kernel,
        out_shape=(jax.ShapeDtypeStruct((rows, _LANES), jnp.float32),
                   jax.ShapeDtypeStruct((grid * 8, 128), jnp.float32)),
        grid=(grid,),
        in_specs=[
            pl.BlockSpec((2, tile_rows, _LANES), lambda i: (0, i, 0)),
            pl.BlockSpec((tile_rows, _LANES), lambda i: (i, 0)),
        ],
        out_specs=(
            pl.BlockSpec((tile_rows, _LANES), lambda i: (i, 0)),
            pl.BlockSpec((8, 128), lambda i: (i, 0)),
        ),
        compiler_params=pltpu.CompilerParams(
            dimension_semantics=("parallel",)),   # megacore-shardable on v7x
    )(lg, lbl)

    parts = parts.reshape(grid, 8, 128)
    sums = jnp.sum(parts[:, :4, 0], axis=0)       # single reduction -> (4,)
    return negloss, sums[0], sums[1], sums[2], sums[3]


def _exact_topk_neg_sum(negloss2d, k_static, k_dyn):
    """Exact two-stage top-k sum over the (rows, LANES) negative-loss map.

    Padded / non-negative anchors carry the -1 sentinel and are excluded by the
    `>= 0` keep condition; the dynamic-k keep mask reproduces torch.topk with
    data-dependent k = min(len(loss_neg), K - num_pos).
    """
    rows, lanes = negloss2d.shape
    k1 = min(lanes, k_static)
    cand, _ = jax.lax.top_k(negloss2d, k1)                 # (rows, k1) per-row
    k2 = min(rows * k1, k_static)
    top_vals, _ = jax.lax.top_k(cand.reshape(-1), k2)      # global over candidates
    keep = (jnp.arange(k2) < k_dyn) & (top_vals >= 0.0)
    return jnp.sum(jnp.where(keep, top_vals, 0.0))


# ------------------------------ loss forward ----------------------------------

def rpn_cls_loss(inputs, target, *, ohem=OHEM, rpn_total_num=RPN_TOTAL_NUM):
    """JAX/Pallas equivalent of RPN_CLS_Loss.forward.

    inputs : (B, N, 2) class logits      (only batch element 0 is used,
    target : (B, 1, N) labels {-1,0,1}    matching the PyTorch module)
    """
    logits = inputs[0].astype(jnp.float32)         # (N, 2)
    labels = target[0, 0]                          # (N,)

    negloss, pos_sum, pos_cnt, val_sum, val_cnt = _ce_parts(logits, labels)

    if ohem:
        # TODO(synk): torch.topk with data-dependent k -> static-k lax.top_k in
        # XLA glue + dynamic mask (data-dependent top-k has no clean Pallas
        # TPU equivalent).
        k_static = min(int(negloss.size), int(rpn_total_num))
        num_pos = pos_cnt.astype(jnp.int32)
        k_dyn = jnp.maximum(rpn_total_num - num_pos, 0)
        neg_topk_sum = _exact_topk_neg_sum(negloss, k_static, k_dyn)
        return (pos_sum + neg_topk_sum) / float(rpn_total_num)
    else:
        mean = val_sum / jnp.maximum(val_cnt, 1.0)
        return jnp.where(val_cnt > 0, jnp.clip(mean, 0.0, 10.0), 0.0)


# --------------------------- pure-JAX reference --------------------------------

def _reference_loss(inputs, target, *, ohem, rpn_total_num):
    logits = inputs[0].astype(jnp.float32)
    labels = target[0, 0].astype(jnp.int32)
    lse = jax.nn.logsumexp(logits, axis=-1)
    picked = jnp.where(labels == 1, logits[:, 1], logits[:, 0])
    loss = lse - picked
    is_pos = labels == 1
    is_neg = labels == 0
    if ohem:
        pos_sum = jnp.sum(jnp.where(is_pos, loss, 0.0))
        num_pos = jnp.sum(is_pos.astype(jnp.int32))
        negloss = jnp.where(is_neg, loss, _NEG_SENTINEL)
        k_static = min(int(negloss.shape[0]), int(rpn_total_num))
        top_vals, _ = jax.lax.top_k(negloss, k_static)
        k_dyn = jnp.maximum(rpn_total_num - num_pos, 0)
        keep = (jnp.arange(k_static) < k_dyn) & (top_vals >= 0.0)
        return (pos_sum + jnp.sum(jnp.where(keep, top_vals, 0.0))) / float(rpn_total_num)
    else:
        valid = is_pos | is_neg
        cnt = jnp.sum(valid.astype(jnp.float32))
        mean = jnp.sum(jnp.where(valid, loss, 0.0)) / jnp.maximum(cnt, 1.0)
        return jnp.where(cnt > 0, jnp.clip(mean, 0.0, 10.0), 0.0)


# ---------------------------------- main ---------------------------------------

if __name__ == "__main__":
    key = jax.random.PRNGKey(0)
    k_logit, k_lbl = jax.random.split(key)

    B, N = 2, 10000   # small anchor count; exercises padding + adaptive tiling
    inputs = jax.random.normal(k_logit, (B, N, 2), jnp.float32)
    # labels: ~1% positive (1), ~55% negative (0), rest ignore (-1)
    u = jax.random.uniform(k_lbl, (B, 1, N))
    target = jnp.where(u < 0.01, 1, jnp.where(u < 0.56, 0, -1)).astype(jnp.int32)

    for name, ohem_flag in (("ohem", True), ("mean", False)):
        fn = jax.jit(functools.partial(rpn_cls_loss, ohem=ohem_flag,
                                       rpn_total_num=RPN_TOTAL_NUM))
        out = fn(inputs, target)
        jax.block_until_ready(out)
        ref = _reference_loss(inputs, target, ohem=ohem_flag,
                              rpn_total_num=RPN_TOTAL_NUM)
        assert out.shape == (), (name, out.shape)
        assert bool(jnp.isfinite(out)), name
        tol = 1e-3 * max(1.0, abs(float(ref)))
        assert abs(float(out) - float(ref)) < tol, (name, float(out), float(ref))

    print("KERNEL_OK")
</pallas_src>

<mosaic_0001>
module attributes {stable_mosaic.version = 11 : i64} {
  func.func @_rpn_cls_loss_kernel(%arg0: i32, %arg1: memref<2x32x512xf32, #tpu.memory_space<vmem>>, %arg2: memref<32x512xi8, #tpu.memory_space<vmem>>, %arg3: memref<32x512xf32, #tpu.memory_space<vmem>>, %arg4: memref<8x128xf32, #tpu.memory_space<vmem>>) attributes {dimension_semantics = [#tpu.dimension_semantics<parallel>], iteration_bounds = array<i64: 1>, scalar_prefetch = 0 : i64, scratch_operands = 0 : i64, tpu.core_type = #tpu.core_type<tc>, window_params = [{transform_indices = @transform_0, window_bounds = array<i64: 2, 32, 512>}, {transform_indices = @transform_1, window_bounds = array<i64: 32, 512>}, {transform_indices = @transform_2, window_bounds = array<i64: 32, 512>}, {transform_indices = @transform_3, window_bounds = array<i64: 8, 128>}]} {
    %c0 = arith.constant 0 : index
    %c0_0 = arith.constant 0 : index
    %c0_1 = arith.constant 0 : index
    %0 = vector.load %arg1[%c0, %c0_0, %c0_1] : memref<2x32x512xf32, #tpu.memory_space<vmem>>, vector<1x32x512xf32>
    %1 = vector.shape_cast %0 : vector<1x32x512xf32> to vector<32x512xf32>
    %c1 = arith.constant 1 : index
    %c0_2 = arith.constant 0 : index
    %c0_3 = arith.constant 0 : index
    %2 = vector.load %arg1[%c1, %c0_2, %c0_3] : memref<2x32x512xf32, #tpu.memory_space<vmem>>, vector<1x32x512xf32>
    %3 = vector.shape_cast %2 : vector<1x32x512xf32> to vector<32x512xf32>
    %c0_4 = arith.constant 0 : index
    %c0_5 = arith.constant 0 : index
    %4 = vector.load %arg2[%c0_4, %c0_5] : memref<32x512xi8, #tpu.memory_space<vmem>>, vector<32x512xi8>
    %5 = arith.extsi %4 : vector<32x512xi8> to vector<32x512xi32>
    %c1_i32 = arith.constant 1 : i32
    %6 = vector.broadcast %c1_i32 : i32 to vector<32x512xi32>
    %7 = arith.cmpi eq, %5, %6 : vector<32x512xi32>
    %c0_i32 = arith.constant 0 : i32
    %8 = vector.broadcast %c0_i32 : i32 to vector<32x512xi32>
    %9 = arith.cmpi eq, %5, %8 : vector<32x512xi32>
    %10 = arith.subf %1, %3 : vector<32x512xf32>
    %11 = arith.subf %3, %1 : vector<32x512xf32>
    %12 = arith.select %7, %10, %11 : vector<32x512xi1>, vector<32x512xf32>
    %cst = arith.constant 0.000000e+00 : f32
    %13 = vector.broadcast %cst : f32 to vector<32x512xf32>
    %14 = arith.maximumf %12, %13 : vector<32x512xf32>
    %15 = math.absf %12 : vector<32x512xf32>
    %cst_6 = arith.constant 0.000000e+00 : f32
    %16 = vector.broadcast %cst_6 : f32 to vector<32x512xf32>
    %17 = arith.subf %16, %15 : vector<32x512xf32>
    %18 = math.exp %17 : vector<32x512xf32>
    %19 = math.log1p %18 : vector<32x512xf32>
    %20 = arith.addf %14, %19 : vector<32x512xf32>
    %21 = arith.extui %7 : vector<32x512xi1> to vector<32x512xi32>
    %22 = arith.sitofp %21 : vector<32x512xi32> to vector<32x512xf32>
    %23 = arith.extui %9 : vector<32x512xi1> to vector<32x512xi32>
    %24 = arith.sitofp %23 : vector<32x512xi32> to vector<32x512xf32>
    %25 = arith.addf %22, %24 : vector<32x512xf32>
    %cst_7 = arith.constant -1.000000e+00 : f32
    %26 = vector.broadcast %cst_7 : f32 to vector<32x512xf32>
    %27 = arith.select %9, %20, %26 : vector<32x512xi1>, vector<32x512xf32>
    %c0_8 = arith.constant 0 : index
    %c0_9 = arith.constant 0 : index
    %28 = vector.load %arg3[%c0_8, %c0_9] : memref<32x512xf32, #tpu.memory_space<vmem>>, vector<32x512xf32>
    tpu.vector_store %arg3[%c0_8, %c0_9], %27 {strides = array<i32>} : memref<32x512xf32, #tpu.memory_space<vmem>>, vector<32x512xf32>,
    %29 = arith.mulf %20, %22 : vector<32x512xf32>
    %30 = vector.shape_cast %29 : vector<32x512xf32> to vector<1x32x512xf32>
    %cst_10 = arith.constant dense<0.000000e+00> : vector<1xf32>
    %31 = vector.multi_reduction <add>, %30, %cst_10 [1, 2] : vector<1x32x512xf32> to vector<1xf32>
    %32 = vector.shape_cast %31 : vector<1xf32> to vector<1x1x1xf32>
    %33 = vector.extract %32[0, 0, 0] : f32 from vector<1x1x1xf32>
    %34 = vector.shape_cast %22 : vector<32x512xf32> to vector<1x32x512xf32>
    %cst_11 = arith.constant dense<0.000000e+00> : vector<1xf32>
    %35 = vector.multi_reduction <add>, %34, %cst_11 [1, 2] : vector<1x32x512xf32> to vector<1xf32>
    %36 = vector.shape_cast %35 : vector<1xf32> to vector<1x1x1xf32>
    %37 = vector.extract %36[0, 0, 0] : f32 from vector<1x1x1xf32>
    %38 = arith.mulf %20, %25 : vector<32x512xf32>
    %39 = vector.shape_cast %38 : vector<32x512xf32> to vector<1x32x512xf32>
    %cst_12 = arith.constant dense<0.000000e+00> : vector<1xf32>
    %40 = vector.multi_reduction <add>, %39, %cst_12 [1, 2] : vector<1x32x512xf32> to vector<1xf32>
    %41 = vector.shape_cast %40 : vector<1xf32> to vector<1x1x1xf32>
    %42 = vector.extract %41[0, 0, 0] : f32 from vector<1x1x1xf32>
    %43 = vector.shape_cast %25 : vector<32x512xf32> to vector<1x32x512xf32>
    %cst_13 = arith.constant dense<0.000000e+00> : vector<1xf32>
    %44 = vector.multi_reduction <add>, %43, %cst_13 [1, 2] : vector<1x32x512xf32> to vector<1xf32>
    %45 = vector.shape_cast %44 : vector<1xf32> to vector<1x1x1xf32>
    %46 = vector.extract %45[0, 0, 0] : f32 from vector<1x1x1xf32>
    %47 = tpu.iota {dimensions = array<i32: 0>} : vector<8x128xi32>
    %c0_i32_14 = arith.constant 0 : i32
    %48 = vector.broadcast %c0_i32_14 : i32 to vector<8x128xi32>
    %49 = arith.cmpi eq, %47, %48 : vector<8x128xi32>
    %c1_i32_15 = arith.constant 1 : i32
    %50 = vector.broadcast %c1_i32_15 : i32 to vector<8x128xi32>
    %51 = arith.cmpi eq, %47, %50 : vector<8x128xi32>
    %c2_i32 = arith.constant 2 : i32
    %52 = vector.broadcast %c2_i32 : i32 to vector<8x128xi32>
    %53 = arith.cmpi eq, %47, %52 : vector<8x128xi32>
    %c3_i32 = arith.constant 3 : i32
    %54 = vector.broadcast %c3_i32 : i32 to vector<8x128xi32>
    %55 = arith.cmpi eq, %47, %54 : vector<8x128xi32>
    %cst_16 = arith.constant 0.000000e+00 : f32
    %56 = vector.broadcast %46 : f32 to vector<8x128xf32>
    %57 = vector.broadcast %cst_16 : f32 to vector<8x128xf32>
    %58 = arith.select %55, %56, %57 : vector<8x128xi1>, vector<8x128xf32>
    %59 = vector.broadcast %42 : f32 to vector<8x128xf32>
    %60 = arith.select %53, %59, %58 : vector<8x128xi1>, vector<8x128xf32>
    %61 = vector.broadcast %37 : f32 to vector<8x128xf32>
    %62 = arith.select %51, %61, %60 : vector<8x128xi1>, vector<8x128xf32>
    %63 = vector.broadcast %33 : f32 to vector<8x128xf32>
    %64 = arith.select %49, %63, %62 : vector<8x128xi1>, vector<8x128xf32>
    %c0_17 = arith.constant 0 : index
    %c0_18 = arith.constant 0 : index
    %65 = vector.load %arg4[%c0_17, %c0_18] : memref<8x128xf32, #tpu.memory_space<vmem>>, vector<8x128xf32>
    tpu.vector_store %arg4[%c0_17, %c0_18], %64 {strides = array<i32>} : memref<8x128xf32, #tpu.memory_space<vmem>>, vector<8x128xf32>,
    return
  }
  func.func @transform_0(%arg0: i32) -> (i32, i32, i32) {
    %c0_i32 = arith.constant 0 : i32
    %c0_i32_0 = arith.constant 0 : i32
    %c0_i32_1 = arith.constant 0 : i32
    return %c0_i32, %arg0, %c0_i32_0 : i32, i32, i32
  }
  func.func @transform_1(%arg0: i32) -> (i32, i32) {
    %c0_i32 = arith.constant 0 : i32
    %c0_i32_0 = arith.constant 0 : i32
    return %arg0, %c0_i32 : i32, i32
  }
  func.func @transform_2(%arg0: i32) -> (i32, i32) {
    %c0_i32 = arith.constant 0 : i32
    %c0_i32_0 = arith.constant 0 : i32
    return %arg0, %c0_i32 : i32, i32
  }
  func.func @transform_3(%arg0: i32) -> (i32, i32) {
    %c0_i32 = arith.constant 0 : i32
    %c0_i32_0 = arith.constant 0 : i32
    return %arg0, %c0_i32 : i32, i32
  }
}

</mosaic_0001>

<bundles_post_ra>
// kernel: rpn_cls_loss.1
= control target key start
LH: loop header
LB: loop body
LE: loop exit
PB: predicated region body
PF: predicated region fallthrough
CT: control target
= control target key end

     0   :  { %v2108_v47 = vmov 0  ;;  %v2111_v46 = vmov 0  ;;  %v2121_v43 = vmov 0  ;;  %s2028_s0 = inlined_call_operand.vmem [shape: f32[2,32,512], index: 0, kind: input, shape index: {}]   ;;  %s2029_s1 = inlined_call_operand.vmem [shape: s8[32,512], index: 1, kind: input, shape index: {}]   ;;  %s2030_s2 = inlined_call_operand.vmem [shape: f32[32,512], index: 2, kind: output, shape index: {0}]   ;;  %s2031_s3 = inlined_call_operand.vmem [shape: f32[8,128], index: 3, kind: output, shape index: {1}]  }
   0x1   :  { %v794_v0 = vld [vmem:[%s2028_s0] sm:$0xff]  ;;  %v799_v1 = vld [vmem:[%s2028_s0 + $0x8] sm:$0xff]  ;;  %v804_v2 = vld [vmem:[%s2028_s0 + $0x10] sm:$0xff] }
   0x2   :  { %v809_v3 = vld [vmem:[%s2028_s0 + $0x18] sm:$0xff]  ;;  %v814_v4 = vld [vmem:[%s2028_s0 + $0x20] sm:$0xff]  ;;  %v819_v5 = vld [vmem:[%s2028_s0 + $0x28] sm:$0xff] }
   0x3   :  { %v824_v6 = vld [vmem:[%s2028_s0 + $0x80] sm:$0xff]  ;;  %v829_v7 = vld [vmem:[%s2028_s0 + $0x30] sm:$0xff]  ;;  %v834_v8 = vld [vmem:[%s2028_s0 + $0x38] sm:$0xff] }
   0x4   :  { %v839_v9 = vld [vmem:[%s2028_s0 + $0x40] sm:$0xff]  ;;  %v844_v10 = vld [vmem:[%s2028_s0 + $0x88] sm:$0xff]  ;;  %v849_v11 = vld [vmem:[%s2028_s0 + $0x90] sm:$0xff]  ;;  %v98_v23 = vsub.f32 %v794_v0, %v824_v6  ;;  %v114_v29 = vsub.f32 %v824_v6, %v794_v0 }
   0x5   :  { %v854_v12 = vld [vmem:[%s2028_s0 + $0x48] sm:$0xff]  ;;  %v859_v13 = vld [vmem:[%s2028_s0 + $0x50] sm:$0xff]  ;;  %v864_v14 = vld [vmem:[%s2028_s0 + $0x58] sm:$0xff]  ;;  %v99_v27 = vsub.f32 %v799_v1, %v844_v10  ;;  %v100_v28 = vsub.f32 %v804_v2, %v849_v11  ;;  %v115_v30 = vsub.f32 %v844_v10, %v799_v1  ;;  %v116_v37 = vsub.f32 %v849_v11, %v804_v2 }
   0x6   :  { %v869_v15 = vld [vmem:[%s2028_s0 + $0x98] sm:$0xff]  ;;  %v874_v16 = vld [vmem:[%s2028_s0 + $0xa0] sm:$0xff]  ;;  %v879_v17 = vld [vmem:[%s2028_s0 + $0xa8] sm:$0xff] }
   0x7   :  { %v884_v18 = vld [vmem:[%s2028_s0 + $0x60] sm:$0xff]  ;;  %v889_v19 = vld [vmem:[%s2028_s0 + $0x68] sm:$0xff]  ;;  %v894_v20 = vld [vmem:[%s2028_s0 + $0xb0] sm:$0xff]  ;;  %v101_v34 = vsub.f32 %v809_v3, %v869_v15  ;;  %v102_v35 = vsub.f32 %v814_v4, %v874_v16  ;;  %v103_v36 = vsub.f32 %v819_v5, %v879_v17  ;;  %v117_v44 = vsub.f32 %v869_v15, %v809_v3 }
   0x8   :  { %v899_v21 = vld [vmem:[%s2028_s0 + $0xb8] sm:$0xff]  ;;  %v904_v22 = vld [vmem:[%s2028_s0 + $0xc0] sm:$0xff]  ;;  %v911_v24 = vld [vmem:[%s2028_s0 + $0xc8] sm:$0xff]  ;;  %v118_v48 = vsub.f32 %v874_v16, %v814_v4  ;;  %v119_v52 = vsub.f32 %v879_v17, %v819_v5  ;;  %v120_v42 = vsub.f32 %v894_v20, %v829_v7 }
   0x9   :  { %v916_v25 = vld [vmem:[%s2028_s0 + $0xd0] sm:$0xff]  ;;  %v921_v26 = vld [vmem:[%s2028_s0 + $0xd8] sm:$0xff]  ;;  %v934_v31 = vld [vmem:[%s2028_s0 + $0xe0] sm:$0xff]  ;;  %v122_v41 = vsub.f32 %v904_v22, %v839_v9  ;;  %v123_v2 = vsub.f32 %v911_v24, %v854_v12 }
   0xa   :  { %v939_v32 = vld [vmem:[%s2028_s0 + $0xe8] sm:$0xff]  ;;  %v944_v33 = vld [vmem:[%s2029_s1] sm:$0xff]  ;;  %v962_v39 = vld [vmem:[%s2029_s1 + $0x10] sm:$0xff]  ;;  %v126_v16 = vsub.f32 %v934_v31, %v884_v18 }
   0xb   :  { %v957_v38 = vld [vmem:[%s2029_s1 + $0x8] sm:$0xff]  ;;  %v967_v40 = vld [vmem:[%s2029_s1 + $0x18] sm:$0xff]  ;;  %v2032_v49 = vunpack.c.0.s8 %v944_v33  ;;  %v2034_v54 = vunpack.c.0.s8 %v962_v39  ;;  %v2036_v56 = vunpack.c.1.s8 %v944_v33  ;;  %v2038_v58 = vunpack.c.1.s8 %v962_v39  ;;  %v27_v15 = vld [vmem:[%s2028_s0 + $0x70] sm:$0xff] }
   0xc   :  { %v2033_v53 = vunpack.c.0.s8 %v957_v38  ;;  %v2035_v55 = vunpack.c.0.s8 %v967_v40  ;;  %v2037_v57 = vunpack.c.1.s8 %v957_v38  ;;  %v2039_v59 = vunpack.c.1.s8 %v967_v40  ;;  %v28_v51 = vld [vmem:[%s2028_s0 + $0x78] sm:$0xff] }
   0xd   :  { %v2040_v60 = vunpack.c.2.s8 %v944_v33  ;;  %v2041_v61 = vunpack.c.2.s8 %v957_v38  ;;  %v2042_v62 = vunpack.c.2.s8 %v962_v39  ;;  %v2043_v63 = vunpack.c.2.s8 %v967_v40 }
   0xe   :  { %v2045_v0 = vunpack.c.3.s8 %v944_v33  ;;  %v2044_v1 = vunpack.c.3.s8 %v957_v38  ;;  %v2046_v3 = vunpack.c.3.s8 %v962_v39  ;;  %v2047_v6 = vunpack.c.3.s8 %v967_v40 }
   0xf   :  { %vm1009_vm0 = vcmp.eq.s32.totalorder %v2032_v49, 1  ;;  %vm1021_vm1 = vcmp.eq.s32.totalorder %v2033_v53, 1  ;;  %vm1027_vm2 = vcmp.eq.s32.totalorder %v2034_v54, 1  ;;  %v2105_v49 = vmov 0  ;;  %v663_v53 = vld [vmem:[%s2028_s0 + $0xf0] sm:$0xff]  ;;  %v664_v54 = vld [vmem:[%s2028_s0 + $0xf8] sm:$0xff] }
  0x10   :  { %v2106_v49 = vsel %vm1027_vm2, 4294967295, %v2105_v49  ;;  %vm1033_vm3 = vcmp.eq.s32.totalorder %v2035_v55, 1  ;;  %vm1039_vm4 = vcmp.eq.s32.totalorder %v2036_v56, 1  ;;  %vm1051_vm5 = vcmp.eq.s32.totalorder %v2037_v57, 1 }
  0x11   :  { %2107 = vst [vmem:[#allocation2_spill] sm:$0xff] %v2106_v49  ;;  %v2109_v47 = vsel %vm1033_vm3, 4294967295, %v2108_v47  ;;  %v2112_v46 = vsel %vm1039_vm4, 4294967295, %v2111_v46  ;;  %v2114_v55 = vmov 0  ;;  %vm1057_vm6 = vcmp.eq.s32.totalorder %v2038_v58, 1 }
  0x12   :  { %2110 = vst [vmem:[#allocation3_spill] sm:$0xff] %v2109_v47  ;;  %2113 = vst [vmem:[#allocation4_spill] sm:$0xff] %v2112_v46  ;;  %v2115_v55 = vsel %vm1051_vm5, 4294967295, %v2114_v55  ;;  %vm1063_vm7 = vcmp.eq.s32.totalorder %v2039_v59, 1  ;;  %vm1069_vm8 = vcmp.eq.s32.totalorder %v2040_v60, 1  ;;  %vm1075_vm9 = vcmp.eq.s32.totalorder %v2041_v61, 1 }
  0x13   :  { %2116 = vst [vmem:[#allocation5_spill] sm:$0xff] %v2115_v55  ;;  %v2122_v43 = vsel %vm1069_vm8, 4294967295, %v2121_v43  ;;  %v2124_v57 = vmov 0  ;;  %vm1081_vm10 = vcmp.eq.s32.totalorder %v2042_v62, 1  ;;  %v2127_v58 = vmov 0 }
  0x14   :  { %2123 = vst [vmem:[#allocation6_spill] sm:$0xff] %v2122_v43  ;;  %v2125_v57 = vsel %vm1075_vm9, 4294967295, %v2124_v57  ;;  %v2128_v58 = vsel %vm1081_vm10, 4294967295, %v2127_v58  ;;  %vm1087_vm11 = vcmp.eq.s32.totalorder %v2043_v63, 1  ;;  %v2130_v59 = vmov 0 }
  0x15   :  { %2126 = vst [vmem:[#allocation7_spill] sm:$0xff] %v2125_v57  ;;  %2129 = vst [vmem:[#allocation8_spill] sm:$0xff] %v2128_v58  ;;  %v2131_v59 = vsel %vm1087_vm11, 4294967295, %v2130_v59  ;;  %v1093_v60 = vsel %vm1009_vm0, %v98_v23, %v114_v29  ;;  %vm1097_vm12 = vcmp.eq.s32.totalorder %v2045_v0, 1  ;;  %v2133_v61 = vmov 0 }
  0x16   :  { %2132 = vst [vmem:[#allocation9_spill] sm:$0xff] %v2131_v59  ;;  %v2134_v61 = vsel %vm1097_vm12, 4294967295, %v2133_v61  ;;  %vm1103_vm13 = vcmp.eq.s32.totalorder %v2044_v1, 1  ;;  %v2136_v62 = vmov 0  ;;  %vm1109_vm14 = vcmp.eq.s32.totalorder %v2046_v3, 1 }
  0x17   :  { %2135 = vst [vmem:[#allocation10_spill] sm:$0xff] %v2134_v61  ;;  %v2137_v62 = vsel %vm1103_vm13, 4294967295, %v2136_v62  ;;  %v2139_v63 = vmov 0  ;;  %v1115_v23 = vsel %vm1021_vm1, %v99_v27, %v115_v30  ;;  %vm1119_vm15 = vcmp.eq.s32.totalorder %v2047_v6, 1 }
  0x18   :  { %2138 = vst [vmem:[#allocation11_spill] sm:$0xff] %v2137_v62  ;;  %v2140_v63 = vsel %vm1109_vm14, 4294967295, %v2139_v63  ;;  %v2142_v29 = vmov 0  ;;  %v112_v1 = vsub.f32 %v27_v15, %v663_v53  ;;  %v113_v0 = vsub.f32 %v28_v51, %v664_v54 }
  0x19   :  { %2141 = vst [vmem:[#allocation12_spill] sm:$0xff] %v2140_v63  ;;  %v2143_v29 = vsel %vm1119_vm15, 4294967295, %v2142_v29  ;;  %v1128_v3 = vsel %vm1027_vm2, %v100_v28, %v116_v37  ;;  %v121_v27 = vsub.f32 %v899_v21, %v834_v8  ;;  %v1136_v30 = vsel %vm1033_vm3, %v101_v34, %v117_v44 }
  0x1a   :  { %2144 = vst [vmem:[#allocation13_spill] sm:$0xff] %v2143_v29  ;;  %v162_v6 = vand.u32 2147483647, %v1093_v60  ;;  %v1148_v11 = vsel %vm1039_vm4, %v102_v35, %v118_v48  ;;  %v163_v28 = vand.u32 2147483647, %v1115_v23  ;;  %v124_v34 = vsub.f32 %v916_v25, %v859_v13 }
  0x1b   :  { %v125_v37 = vsub.f32 %v921_v26, %v864_v14  ;;  %v1160_v44 = vsel %vm1051_vm5, %v103_v36, %v119_v52  ;;  %v164_v4 = vand.u32 2147483647, %v1128_v3  ;;  %v127_v35 = vsub.f32 %v939_v32, %v889_v19 }
  0x1c   :  { %v128_v48 = vsub.f32 %v663_v53, %v27_v15  ;;  %v165_v46 = vand.u32 2147483647, %v1136_v30  ;;  %v129_v47 = vsub.f32 %v664_v54, %v28_v51  ;;  %v2145_v49 = vsub.f32 %v829_v7, %v894_v20 }
  0x1d   :  { %v166_v17 = vand.u32 2147483647, %v1148_v11  ;;  %v178_v36 = vsub.f32 0.0, %v162_v6  ;;  %v2147_v52 = vsub.f32 %v834_v8, %v899_v21  ;;  %v2149_v51 = vsub.f32 %v839_v9, %v904_v22 }
  0x1e   :  { %v1173_v5 = vsel %vm1057_vm6, %v2145_v49, %v120_v42  ;;  %v167_v20 = vand.u32 2147483647, %v1160_v44  ;;  %v179_v42 = vsub.f32 0.0, %v163_v28  ;;  %v2151_v49 = vsub.f32 %v854_v12, %v911_v24 }
  0x1f   :  { %2146 = vst [vmem:[#allocation14_spill] sm:$0xff] %v1173_v5  ;;  %v1181_v55 = vsel %vm1063_vm7, %v2147_v52, %v121_v27  ;;  %v1188_v7 = vsel %vm1069_vm8, %v2149_v51, %v122_v41  ;;  %v2153_v21 = vsub.f32 %v859_v13, %v916_v25  ;;  %v2155_v22 = vsub.f32 %v864_v14, %v921_v26 }
  0x20   :  { %2148 = vst [vmem:[#allocation15_spill] sm:$0xff] %v1181_v55  ;;  %2150 = vst [vmem:[#allocation16_spill] sm:$0xff] %v1188_v7  ;;  %v1196_v8 = vsel %vm1075_vm9, %v2151_v49, %v123_v2  ;;  %v180_v53 = vsub.f32 0.0, %v164_v4  ;;  %v2157_v12 = vsub.f32 %v884_v18, %v934_v31  ;;  %v2159_v13 = vsub.f32 %v889_v19, %v939_v32 }
  0x21   :  { %2152 = vst [vmem:[#allocation17_spill] sm:$0xff] %v1196_v8  ;;  %v1203_v9 = vsel %vm1081_vm10, %v2153_v21, %v124_v34  ;;  %v1210_v41 = vsel %vm1087_vm11, %v2155_v22, %v125_v37  ;;  %v168_v14 = vand.u32 2147483647, %v1173_v5  ;;  %v181_v26 = vsub.f32 0.0, %v165_v46 }
  0x22   :  { %2154 = vst [vmem:[#allocation18_spill] sm:$0xff] %v1203_v9  ;;  %2156 = vst [vmem:[#allocation19_spill] sm:$0xff] %v1210_v41  ;;  %v1217_v24 = vsel %vm1097_vm12, %v2157_v12, %v126_v16  ;;  %v1224_v25 = vsel %vm1103_vm13, %v2159_v13, %v127_v35  ;;  %v1229_v54 = vsel %vm1109_vm14, %v112_v1, %v128_v48  ;;  %v169_v18 = vand.u32 2147483647, %v1181_v55 }
  0x23   :  { %2158 = vst [vmem:[#allocation20_spill] sm:$0xff] %v1217_v24  ;;  %2160 = vst [vmem:[#allocation21_spill] sm:$0xff] %v1224_v25  ;;  %v182_v31 = vsub.f32 0.0, %v166_v17  ;;  %v194_v6 = vmul.f32 1.442695, %v178_v36  ;;  %v1234_v15 = vsel %vm1119_vm15, %v113_v0, %v129_v47  ;;  %v183_v32 = vsub.f32 0.0, %v167_v20 }
  0x24   :  { %2161 = vst [vmem:[#allocation22_spill] sm:$0xff] %v1229_v54  ;;  %2162 = vst [vmem:[#allocation23_spill] sm:$0xff] %v1234_v15  ;;  %v170_v19 = vand.u32 2147483647, %v1188_v7  ;;  %v196_v27 = vmul.f32 1.442695, %v179_v42  ;;  %v2257_v57 = vunpack.c.3.s8 %v957_v38 }
  0x25   :  { %v171_v28 = vand.u32 2147483647, %v1196_v8  ;;  %v198_v1 = vmul.f32 1.442695, %v180_v53  ;;  %v172_v37 = vand.u32 2147483647, %v1203_v9  ;;  %706 = vpow2.f32 %v194_v6 }
  0x26   :  { %v184_v4 = vsub.f32 0.0, %v168_v14  ;;  %v200_v16 = vmul.f32 1.442695, %v181_v26  ;;  %v173_v47 = vand.u32 2147483647, %v1210_v41  ;;  %v185_v0 = vsub.f32 0.0, %v169_v18 }
  0x27   :  { %v202_v35 = vmul.f32 1.442695, %v182_v31  ;;  %v174_v48 = vand.u32 2147483647, %v1217_v24  ;;  %v186_v17 = vsub.f32 0.0, %v170_v19  ;;  %708 = vpow2.f32 %v196_v27 }
  0x28   :  { %v204_v36 = vmul.f32 1.442695, %v183_v32  ;;  %v175_v51 = vand.u32 2147483647, %v1224_v25  ;;  %v187_v20 = vsub.f32 0.0, %v171_v28  ;;  %710 = vpow2.f32 %v198_v1 }
  0x29   :  { %v176_v42 = vand.u32 2147483647, %v1229_v54  ;;  %v188_v49 = vsub.f32 0.0, %v172_v37  ;;  %712 = vpow2.f32 %v200_v16  ;;  %v206_v21 = vmul.f32 1.442695, %v184_v4 }
  0x2a   :  { %v177_v22 = vand.u32 2147483647, %v1234_v15  ;;  %v189_v53 = vsub.f32 0.0, %v173_v47  ;;  %714 = vpow2.f32 %v202_v35  ;;  %v208_v12 = vmul.f32 1.442695, %v185_v0 }
  0x2b   :  { %v190_v14 = vsub.f32 0.0, %v174_v48  ;;  %716 = vpow2.f32 %v204_v36  ;;  %v210_v26 = vmul.f32 1.442695, %v186_v17  ;;  %v2163_v18 = vunpack.c.0.s8 %v944_v33 }
  0x2c   :  { %v2164_v31 = vmov 0  ;;  %v191_v32 = vsub.f32 0.0, %v175_v51  ;;  %v212_v27 = vmul.f32 1.442695, %v187_v20  ;;  %v2167_v28 = vunpack.c.0.s8 %v957_v38 }
  0x2d   :  { %vm1251_vm15 = vcmp.eq.s32.totalorder %v2163_v18, 0  ;;  %v2168_v1 = vmov 0  ;;  %v192_v4 = vsub.f32 0.0, %v176_v42  ;;  %718 = vpow2.f32 %v206_v21 }
  0x2e   :  { %v2165_v31 = vsel %vm1251_vm15, 4294967295, %v2164_v31  ;;  %vm1259_vm14 = vcmp.eq.s32.totalorder %v2167_v28, 0  ;;  %v214_v16 = vmul.f32 1.442695, %v188_v49  ;;  %v2171_v47 = vunpack.c.0.s8 %v962_v39 }
  0x2f   :  { %2166 = vst [vmem:[#allocation24_spill] sm:$0xff] %v2165_v31  ;;  %v2169_v1 = vsel %vm1259_vm14, 4294967295, %v2168_v1  ;;  %v2172_v0 = vmov 0  ;;  %v2175_v35 = vunpack.c.0.s8 %v967_v40  ;;  %v2176_v48 = vmov 0  ;;  %v1279_v21 = vpop.eup %706 }
  0x30   :  { %2170 = vst [vmem:[#allocation25_spill] sm:$0xff] %v2169_v1  ;;  %vm1266_vm13 = vcmp.eq.s32.totalorder %v2171_v47, 0  ;;  %v193_v36 = vsub.f32 0.0, %v177_v22  ;;  %720 = vpow2.f32 %v208_v12  ;;  %v216_v51 = vmul.f32 1.442695, %v189_v53 }
  0x31   :  { %v2173_v0 = vsel %vm1266_vm13, 4294967295, %v2172_v0  ;;  %vm1272_vm12 = vcmp.eq.s32.totalorder %v2175_v35, 0  ;;  %722 = vpow2.f32 %v210_v26  ;;  %v218_v49 = vmul.f32 1.442695, %v190_v14  ;;  %v1283_v35 = vpop.eup %708 }
  0x32   :  { %2174 = vst [vmem:[#allocation26_spill] sm:$0xff] %v2173_v0  ;;  %v2177_v48 = vsel %vm1272_vm12, 4294967295, %v2176_v48  ;;  %724 = vpow2.f32 %v212_v27  ;;  %v220_v47 = vmul.f32 1.442695, %v191_v32  ;;  %v222_v12 = vmul.f32 1.442695, %v192_v4  ;;  %v1287_v20 = vpop.eup %710 }
  0x33   :  { %2178 = vst [vmem:[#allocation27_spill] sm:$0xff] %v2177_v48  ;;  %726 = vpow2.f32 %v214_v16  ;;  %v224_v26 = vmul.f32 1.442695, %v193_v36  ;;  %v2062_v42 = vmov 0.0   ;;  %v1295_v32 = vpop.eup %712  ;;  %v226_v22 = vadd.f32 1.0, %v1279_v21 }
  0x34   :  { %728 = vpow2.f32 %v216_v51  ;;  %v1293_v27 = vsel %vm1009_vm0, 1.0, %v2062_v42  ;;  %v1301_v4 = vsel %vm1021_vm1, 1.0, %v2062_v42  ;;  %v1306_v36 = vsel %vm1027_vm2, 1.0, %v2062_v42  ;;  %v1308_v51 = vpop.eup %714 }
  0x35   :  { %2179 = vst [vmem:[#allocation28_spill] sm:$0xff] %v1293_v27  ;;  %730 = vpow2.f32 %v218_v49  ;;  %2180 = vst [vmem:[#allocation29_spill] sm:$0xff] %v1301_v4  ;;  %v235_v10 = vadd.f32 1.0, %v1283_v35  ;;  %v1314_v49 = vsel %vm1033_vm3, 1.0, %v2062_v42  ;;  %v1319_v50 = vsel %vm1039_vm4, 1.0, %v2062_v42  ;;  %v1321_v28 = vpop.eup %716 }
  0x36   :  { %2182 = vst [vmem:[#allocation2_spill] sm:$0xff] %v1306_v36  ;;  %732 = vpow2.f32 %v220_v47  ;;  %2184 = vst [vmem:[#allocation3_spill] sm:$0xff] %v1314_v49  ;;  %v244_v16 = vadd.f32 1.0, %v1287_v20  ;;  %v1327_v47 = vsel %vm1051_vm5, 1.0, %v2062_v42  ;;  %v1332_v14 = vsel %vm1057_vm6, 1.0, %v2062_v42 }
  0x37   :  { %2186 = vst [vmem:[#allocation4_spill] sm:$0xff] %v1319_v50  ;;  %734 = vpow2.f32 %v222_v12  ;;  %2188 = vst [vmem:[#allocation5_spill] sm:$0xff] %v1327_v47  ;;  %v229_v53 = vmul.f32 -0.5, %v1279_v21  ;;  %v238_v17 = vmul.f32 -0.5, %v1283_v35  ;;  %v253_v37 = vadd.f32 1.0, %v1295_v32  ;;  %v1337_v12 = vpop.eup %718 }
  0x38   :  { %2189 = vst [vmem:[#allocation30_spill] sm:$0xff] %v1332_v14  ;;  %736 = vpow2.f32 %v224_v26  ;;  %v262_v19 = vadd.f32 1.0, %v1308_v51  ;;  %v1343_v18 = vsel %vm1063_vm7, 1.0, %v2062_v42  ;;  %v1348_v56 = vsel %vm1251_vm15, 1.0, %v2062_v42 }
  0x39   :  { %738 = vlog2.f32 %v226_v22  ;;  %2190 = vst [vmem:[#allocation31_spill] sm:$0xff] %v1343_v18  ;;  %2191 = vst [vmem:[#allocation32_spill] sm:$0xff] %v1348_v56  ;;  %v247_v6 = vmul.f32 -0.5, %v1287_v20  ;;  %v271_v13 = vadd.f32 1.0, %v1321_v28  ;;  %v1357_v22 = vsel %vm1259_vm14, 1.0, %v2062_v42 }
  0x3a   :  { %v1350_v26 = vpop.eup %720  ;;  %740 = vlog2.f32 %v235_v10  ;;  %2192 = vst [vmem:[#allocation33_spill] sm:$0xff] %v1357_v22  ;;  %v256_v52 = vmul.f32 -0.5, %v1295_v32  ;;  %v1365_v34 = vsel %vm1266_vm13, 1.0, %v2062_v42  ;;  %v1370_v10 = vsel %vm1272_vm12, 1.0, %v2062_v42 }
  0x3b   :  { %v1359_v45 = vpop.eup %722  ;;  %742 = vlog2.f32 %v244_v16  ;;  %2193 = vst [vmem:[#allocation34_spill] sm:$0xff] %v1365_v34  ;;  %2194 = vst [vmem:[#allocation35_spill] sm:$0xff] %v1370_v10  ;;  %v230_v2 = vadd.f32 1.0, %v229_v53  ;;  %v232_v18 = vand.u32 2147483647, %v1279_v21  ;;  %v239_v29 = vadd.f32 1.0, %v238_v17 }
  0x3c   :  { %v1372_v46 = vpop.eup %724  ;;  %744 = vlog2.f32 %v253_v37  ;;  %v241_v14 = vand.u32 2147483647, %v1283_v35  ;;  %v250_v31 = vand.u32 2147483647, %v1287_v20  ;;  %v265_v47 = vmul.f32 -0.5, %v1308_v51 }
  0x3d   :  { %v1375_v16 = vpop.eup %726  ;;  %746 = vlog2.f32 %v262_v19  ;;  %v248_v42 = vadd.f32 1.0, %v247_v6  ;;  %v274_v50 = vmul.f32 -0.5, %v1321_v28  ;;  %v280_v53 = vadd.f32 1.0, %v1337_v12 }
  0x3e   :  { %v1380_v63 = vpop.eup %728  ;;  %748 = vlog2.f32 %v271_v13  ;;  %v257_v37 = vadd.f32 1.0, %v256_v52  ;;  %v259_v17 = vand.u32 2147483647, %v1295_v32  ;;  %v283_v61 = vmul.f32 -0.5, %v1337_v12 }
  0x3f   :  { %v1384_v62 = vpop.eup %730  ;;  %v289_v59 = vadd.f32 1.0, %v1350_v26  ;;  %v1392_v58 = vmul.f32 %v1279_v21, %v230_v2  ;;  %v1395_v13 = vmul.f32 %v1283_v35, %v239_v29  ;;  %v268_v6 = vand.u32 2147483647, %v1308_v51 }
  0x40   :  { %v1389_v19 = vpop.eup %732  ;;  %v298_v10 = vadd.f32 1.0, %v1359_v45  ;;  %vm1401_vm0 = vcmp.lt.f32.partialorder %v232_v18, 0.0004427343  ;;  %vm1405_vm1 = vcmp.lt.f32.partialorder %v241_v14, 0.0004427343  ;;  %v266_v29 = vadd.f32 1.0, %v265_v47 }
  0x41   :  { %v1399_v49 = vpop.eup %734  ;;  %vm1409_vm2 = vcmp.lt.f32.partialorder %v250_v31, 0.0004427343  ;;  %v292_v21 = vmul.f32 -0.5, %v1350_v26  ;;  %v307_v35 = vadd.f32 1.0, %v1372_v46  ;;  %v1418_v18 = vmul.f32 %v1287_v20, %v248_v42 }
  0x42   :  { %v1415_v43 = vpop.eup %736  ;;  %v275_v48 = vadd.f32 1.0, %v274_v50  ;;  %v277_v14 = vand.u32 2147483647, %v1321_v28  ;;  %750 = vlog2.f32 %v280_v53  ;;  %v1422_v31 = vmul.f32 %v1295_v32, %v257_v37 }
  0x43   :  { %v739_v0 = vpop.eup %738  ;;  %vm1424_vm3 = vcmp.lt.f32.partialorder %v259_v17, 0.0004427343  ;;  %v284_v47 = vadd.f32 1.0, %v283_v61  ;;  %752 = vlog2.f32 %v289_v59  ;;  %vm1428_vm4 = vcmp.lt.f32.partialorder %v268_v6, 0.0004427343 }
  0x44   :  { %v741_v15 = vpop.eup %740  ;;  %754 = vlog2.f32 %v298_v10  ;;  %v301_v20 = vmul.f32 -0.5, %v1359_v45  ;;  %v316_v42 = vadd.f32 1.0, %v1375_v16  ;;  %v1435_v32 = vmul.f32 %v1308_v51, %v266_v29 }
  0x45   :  { %v743_v50 = vpop.eup %742  ;;  %v286_v53 = vand.u32 2147483647, %v1337_v12  ;;  %v293_v37 = vadd.f32 1.0, %v292_v21  ;;  %756 = vlog2.f32 %v307_v35  ;;  %v1439_v59 = vmul.f32 %v1321_v28, %v275_v48 }
  0x46   :  { %v745_v61 = vpop.eup %744  ;;  %vm1441_vm5 = vcmp.lt.f32.partialorder %v277_v14, 0.0004427343  ;;  %v295_v10 = vand.u32 2147483647, %v1350_v26  ;;  %v310_v6 = vmul.f32 -0.5, %v1372_v46  ;;  %v1450_v51 = vmul.f32 %v1337_v12, %v284_v47 }
  0x47   :  { %v747_v34 = vpop.eup %746  ;;  %v1447_v36 = vmul.f32 0.6931472, %v739_v0  ;;  %v304_v29 = vand.u32 2147483647, %v1359_v45  ;;  %v325_v21 = vadd.f32 1.0, %v1380_v63  ;;  %v302_v14 = vadd.f32 1.0, %v301_v20 }
  0x48   :  { %v749_v48 = vpop.eup %748  ;;  %v1454_v28 = vmul.f32 0.6931472, %v741_v15  ;;  %v1456_v35 = vmul.f32 0.6931472, %v743_v50  ;;  %758 = vlog2.f32 %v316_v42  ;;  %vm1458_vm6 = vcmp.lt.f32.partialorder %v286_v53, 0.0004427343 }
  0x49   :  { %v1463_v0 = vmul.f32 %v1350_v26, %v293_v37  ;;  %v313_v12 = vand.u32 2147483647, %v1372_v46  ;;  %v319_v47 = vmul.f32 -0.5, %v1375_v16  ;;  %v334_v4 = vadd.f32 1.0, %v1384_v62 }
  0x4a   :  { %v1468_v25 = vmul.f32 0.6931472, %v745_v61  ;;  %v1470_v15 = vmul.f32 0.6931472, %v747_v34  ;;  %vm1472_vm7 = vcmp.lt.f32.partialorder %v295_v10, 0.0004427343  ;;  %760 = vlog2.f32 %v325_v21 }
  0x4b   :  { %v311_v42 = vadd.f32 1.0, %v310_v6  ;;  %v1476_v50 = vmul.f32 0.6931472, %v749_v48  ;;  %vm1478_vm15 = vcmp.lt.f32.partialorder %v304_v29, 0.0004427343  ;;  %762 = vlog2.f32 %v334_v4 }
  0x4c   :  { %v343_v53 = vadd.f32 1.0, %v1389_v19  ;;  %v751_v37 = vpop.eup %750  ;;  %v1496_v4 = vmul.f32 %v1359_v45, %v302_v14  ;;  %vm1498_vm11 = vcmp.lt.f32.partialorder %v313_v12, 0.0004427343  ;;  %v320_v21 = vadd.f32 1.0, %v319_v47 }
  0x4d   :  { %2211 = vst [vmem:[#allocation36_spill] sm:$0xff] %v1476_v50  ;;  %v753_v6 = vpop.eup %752  ;;  %v328_v48 = vmul.f32 -0.5, %v1380_v63  ;;  %v1512_v14 = vmul.f32 %v1372_v46, %v311_v42  ;;  %v352_v12 = vadd.f32 1.0, %v1399_v49  ;;  %v322_v10 = vand.u32 2147483647, %v1375_v16 }
  0x4e   :  { %764 = vlog2.f32 %v343_v53  ;;  %v755_v34 = vpop.eup %754  ;;  %v331_v61 = vand.u32 2147483647, %v1380_v63  ;;  %v337_v56 = vmul.f32 -0.5, %v1384_v62  ;;  %v1522_v27 = vmul.f32 0.6931472, %v751_v37 }
  0x4f   :  { %v757_v47 = vpop.eup %756  ;;  %v346_v45 = vmul.f32 -0.5, %v1389_v19  ;;  %766 = vlog2.f32 %v352_v12  ;;  %v361_v46 = vadd.f32 1.0, %v1415_v43  ;;  %v1526_v42 = vmul.f32 0.6931472, %v753_v6 }
  0x50   :  { %v1529_v24 = vmul.f32 %v1375_v16, %v320_v21  ;;  %v329_v41 = vadd.f32 1.0, %v328_v48  ;;  %v355_v53 = vmul.f32 -0.5, %v1399_v49  ;;  %v1532_v8 = vmul.f32 0.6931472, %v755_v34 }
  0x51   :  { %v1534_v7 = vmul.f32 0.6931472, %v757_v47  ;;  %v340_v37 = vand.u32 2147483647, %v1384_v62  ;;  %768 = vlog2.f32 %v361_v46  ;;  %vm1537_vm10 = vcmp.lt.f32.partialorder %v322_v10, 0.0004427343 }
  0x52   :  { %v759_v9 = vpop.eup %758  ;;  %vm1541_vm9 = vcmp.lt.f32.partialorder %v331_v61, 0.0004427343  ;;  %v338_v16 = vadd.f32 1.0, %v337_v56  ;;  %v364_v21 = vmul.f32 -0.5, %v1415_v43  ;;  %v288_v34 = vsel %vm1458_vm6, %v1450_v51, %v1522_v27 }
  0x53   :  { %v347_v47 = vadd.f32 1.0, %v346_v45  ;;  %v349_v46 = vand.u32 2147483647, %v1389_v19  ;;  %v358_v10 = vand.u32 2147483647, %v1399_v49  ;;  %v297_v61 = vsel %vm1472_vm7, %v1463_v0, %v1526_v42 }
  0x54   :  { %v761_v48 = vpop.eup %760  ;;  %v318_v56 = vmul.f32 0.6931472, %v759_v9  ;;  %v330_v5 = vmul.f32 %v1380_v63, %v329_v41  ;;  %v356_v50 = vadd.f32 1.0, %v355_v53  ;;  %v306_v27 = vsel %vm1478_vm15, %v1496_v4, %v1532_v8 }
  0x55   :  { %v763_v55 = vpop.eup %762  ;;  %v315_v22 = vsel %vm1498_vm11, %v1512_v14, %v1534_v7  ;;  %vm1565_vm6 = vcmp.lt.f32.partialorder %v340_v37, 0.0004427343  ;;  %v367_v0 = vand.u32 2147483647, %v1415_v43  ;;  %v327_v20 = vmul.f32 0.6931472, %v761_v48 }
  0x56   :  { %v336_v63 = vmul.f32 0.6931472, %v763_v55  ;;  %v339_v41 = vmul.f32 %v1384_v62, %v338_v16  ;;  %v365_v45 = vadd.f32 1.0, %v364_v21  ;;  %v2222_v26 = vunpack.c.1.s8 %v944_v33 }
  0x57   :  { %v2223_v8 = vmov 0  ;;  %v2225_v7 = vunpack.c.1.s8 %v957_v38  ;;  %v2226_v4 = vmov 0  ;;  %v2228_v29 = vunpack.c.1.s8 %v962_v39 }
  0x58   :  { %v765_v9 = vpop.eup %764  ;;  %vm1573_vm15 = vcmp.eq.s32.totalorder %v2222_v26, 0  ;;  %v2229_v14 = vmov 0  ;;  %v348_v62 = vmul.f32 %v1389_v19, %v347_v47  ;;  %vm1590_vm8 = vcmp.lt.f32.partialorder %v349_v46, 0.0004427343 }
  0x59   :  { %v2224_v8 = vsel %vm1573_vm15, 4294967295, %v2223_v8  ;;  %vm1579_vm11 = vcmp.eq.s32.totalorder %v2225_v7, 0  ;;  %vm1585_vm7 = vcmp.eq.s32.totalorder %v2228_v29, 0  ;;  %v345_v55 = vmul.f32 0.6931472, %v765_v9 }
  0x5a   :  { %v2227_v4 = vsel %vm1579_vm11, 4294967295, %v2226_v4  ;;  %v2230_v14 = vsel %vm1585_vm7, 4294967295, %v2229_v14  ;;  %vm1594_vm15 = vcmp.lt.f32.partialorder %v358_v10, 0.0004427343  ;;  %v2235_v37 = vunpack.c.1.s8 %v967_v40 }
  0x5b   :  { %v2238_v21 = vunpack.c.2.s8 %v944_v33  ;;  %v2241_v19 = vunpack.c.2.s8 %v957_v38  ;;  %v2242_v47 = vmov 0  ;;  %v2244_v46 = vunpack.c.2.s8 %v962_v39 }
  0x5c   :  { %vm1600_vm11 = vcmp.eq.s32.totalorder %v2235_v37, 0  ;;  %v2245_v10 = vmov 0  ;;  %v324_v9 = vsel %vm1537_vm10, %v1529_v24, %v318_v56  ;;  %v357_v26 = vmul.f32 %v1399_v49, %v356_v50  ;;  %v767_v24 = vpop.eup %766 }
  0x5d   :  { %vm1606_vm7 = vcmp.eq.s32.totalorder %v2238_v21, 0  ;;  %vm1612_vm12 = vcmp.eq.s32.totalorder %v2241_v19, 0  ;;  %vm1618_vm13 = vcmp.eq.s32.totalorder %v2244_v46, 0  ;;  %v2247_v7 = vmax.f32 %v1093_v60, 0.0 }
  0x5e   :  { %v2243_v47 = vsel %vm1612_vm12, 4294967295, %v2242_v47  ;;  %v2246_v10 = vsel %vm1618_vm13, 4294967295, %v2245_v10  ;;  %v2248_v29 = vsel %vm1401_vm0, %v1392_v58, %v1447_v36  ;;  %v2249_v21 = vmax.f32 %v1115_v23, 0.0 }
  0x5f   :  { %v1633_v37 = vadd.f32 %v2248_v29, %v2247_v7  ;;  %v2250_v19 = vsel %vm1405_vm1, %v1395_v13, %v1454_v28  ;;  %v2251_v49 = vunpack.c.2.s8 %v967_v40  ;;  %v2254_v58 = vunpack.c.3.s8 %v944_v33  ;;  %v2285_v29 = vld [vmem:[#allocation18_spill] sm:$0xff] }
  0x60   :  { %v1642_v12 = vadd.f32 %v2250_v19, %v2249_v21  ;;  %vm1658_vm13 = vcmp.eq.s32.totalorder %v2257_v57, 0  ;;  %v2260_v13 = vunpack.c.3.s8 %v962_v39  ;;  %vm1668_vm12 = vcmp.lt.f32.partialorder %v367_v0, 0.0004427343  ;;  %v2287_v19 = vld [vmem:[#allocation19_spill] sm:$0xff]  ;;  %v2292_v57 = vld [vmem:[#allocation32_spill] sm:$0xff] }
  0x61   :  { %vm1646_vm10 = vcmp.eq.s32.totalorder %v2251_v49, 0  ;;  %vm1652_vm0 = vcmp.eq.s32.totalorder %v2254_v58, 0  ;;  %v2265_v33 = vmax.f32 %v1128_v3, 0.0  ;;  %v2266_v38 = vsel %vm1409_vm2, %v1418_v18, %v1456_v35  ;;  %v2289_v49 = vld [vmem:[#allocation20_spill] sm:$0xff] }
  0x62   :  { %vm1664_vm1 = vcmp.eq.s32.totalorder %v2260_v13, 0  ;;  %v2267_v56 = vmax.f32 %v1136_v30, 0.0  ;;  %v2268_v39 = vsel %vm1424_vm3, %v1422_v31, %v1468_v25  ;;  %v2269_v46 = vmax.f32 %v1148_v11, 0.0  ;;  %v769_v31 = vpop.eup %768  ;;  %v2291_v58 = vld [vmem:[#allocation28_spill] sm:$0xff] }
  0x63   :  { %v1679_v50 = vadd.f32 %v2266_v38, %v2265_v33  ;;  %v2270_v3 = vsel %vm1428_vm4, %v1435_v32, %v1470_v15  ;;  %v2271_v18 = vunpack.c.3.s8 %v967_v40  ;;  %v333_v25 = vsel %vm1541_vm9, %v330_v5, %v327_v20  ;;  %v2275_v40 = vld [vmem:[#allocation36_spill] sm:$0xff]  ;;  %v2277_v5 = vld [vmem:[#allocation14_spill] sm:$0xff]  ;;  %v2279_v20 = vld [vmem:[#allocation15_spill] sm:$0xff] }
  0x64   :  { %v1688_v0 = vadd.f32 %v2268_v39, %v2267_v56  ;;  %v1697_v2 = vadd.f32 %v2270_v3, %v2269_v46  ;;  %v342_v1 = vsel %vm1565_vm6, %v339_v41, %v336_v63  ;;  %v354_v11 = vmul.f32 0.6931472, %v767_v24  ;;  %v2296_v56 = vld [vmem:[#allocation33_spill] sm:$0xff]  ;;  %v2297_v46 = vld [vmem:[#allocation2_spill] sm:$0xff] }
  0x65   :  { %vm1701_vm2 = vcmp.eq.s32.totalorder %v2271_v18, 0  ;;  %v366_v54 = vmul.f32 %v1415_v43, %v365_v45  ;;  %v351_v32 = vsel %vm1590_vm8, %v348_v62, %v345_v55  ;;  %v2274_v35 = vmax.f32 %v1160_v44, 0.0  ;;  %v2281_v44 = vld [vmem:[#allocation16_spill] sm:$0xff]  ;;  %v2283_v62 = vld [vmem:[#allocation17_spill] sm:$0xff]  ;;  %v2298_v3 = vld [vmem:[#allocation34_spill] sm:$0xff] }
  0x66   :  { %v2276_v15 = vsel %vm1441_vm5, %v1439_v59, %v2275_v40  ;;  %v2278_v6 = vmax.f32 %v2277_v5, 0.0  ;;  %v2280_v63 = vmax.f32 %v2279_v20, 0.0  ;;  %v360_v41 = vsel %vm1594_vm15, %v357_v26, %v354_v11  ;;  %v2306_v5 = vld [vmem:[#allocation27_spill] sm:$0xff] }
  0x67   :  { %v1719_v7 = vadd.f32 %v2276_v15, %v2274_v35  ;;  %v363_v45 = vmul.f32 0.6931472, %v769_v31  ;;  %v2282_v55 = vmax.f32 %v2281_v44, 0.0  ;;  %v2284_v59 = vmax.f32 %v2283_v62, 0.0  ;;  %v2301_v31 = vld [vmem:[#allocation23_spill] sm:$0xff] }
  0x68   :  { %v1723_v51 = vadd.f32 %v288_v34, %v2278_v6  ;;  %v1727_v43 = vadd.f32 %v297_v61, %v2280_v63  ;;  %v2286_v21 = vmax.f32 %v2285_v29, 0.0  ;;  %v2288_v24 = vmax.f32 %v2287_v19, 0.0 }
  0x69   :  { %v1733_v17 = vadd.f32 %v306_v27, %v2282_v55  ;;  %v1737_v53 = vadd.f32 %v315_v22, %v2284_v59  ;;  %v2290_v42 = vmax.f32 %v2289_v49, 0.0  ;;  %v450_v27 = vadd.f32 %v2292_v57, %v2291_v58  ;;  %v2293_v22 = vld [vmem:[#allocation21_spill] sm:$0xff]  ;;  %v2314_v49 = vld [vmem:[#allocation6_spill] sm:$0xff]  ;;  %v2316_v57 = vld [vmem:[#allocation7_spill] sm:$0xff] }
  0x6a   :  { %v1741_v34 = vadd.f32 %v324_v9, %v2286_v21  ;;  %v1745_v61 = vadd.f32 %v333_v25, %v2288_v24  ;;  %v369_v13 = vsel %vm1668_vm12, %v366_v54, %v363_v45  ;;  %v2294_v33 = vmax.f32 %v2293_v22, 0.0  ;;  %v2295_v9 = vld [vmem:[#allocation29_spill] sm:$0xff]  ;;  %v2299_v25 = vld [vmem:[#allocation22_spill] sm:$0xff] }
  0x6b   :  { %v1749_v26 = vadd.f32 %v342_v1, %v2290_v42  ;;  %v451_v39 = vadd.f32 %v2296_v56, %v2295_v9  ;;  %v1763_v18 = vadd.f32 %v2298_v3, %v2297_v46  ;;  %v2300_v1 = vmax.f32 %v2299_v25, 0.0  ;;  %v2319_v56 = vld [vmem:[#allocation35_spill] sm:$0xff] }
  0x6c   :  { %v1757_v38 = vadd.f32 %v351_v32, %v2294_v33  ;;  %v2302_v35 = vmax.f32 %v2301_v31, 0.0  ;;  %v467_v54 = vsel %vm1259_vm14, %v1642_v12, -1.0  ;;  %v2304_v32 = vld [vmem:[#allocation26_spill] sm:$0xff]  ;;  %vm2307_vm9 = vnez %v2306_v5 }
  0x6d   :  { %v1767_v11 = vadd.f32 %v360_v41, %v2300_v1  ;;  %vm2305_vm8 = vnez %v2304_v32  ;;  %v469_v6 = vsel %vm2307_vm9, %v1688_v0, -1.0  ;;  %vm2308_vm12 = vnez %v2224_v8  ;;  %483 = vst [vmem:[%s2030_s2 + $0x8] sm:$0xff] %v467_v54  ;;  %v2318_v8 = vld [vmem:[#allocation3_spill] sm:$0xff]  ;;  %v2322_v54 = vld [vmem:[#allocation9_spill] sm:$0xff] }
  0x6e   :  { %v1771_v40 = vadd.f32 %v369_v13, %v2302_v35  ;;  %v468_v15 = vsel %vm2305_vm8, %v1679_v50, -1.0  ;;  %v470_v20 = vsel %vm2308_vm12, %v1697_v2, -1.0  ;;  %vm2309_vm3 = vnez %v2227_v4  ;;  %485 = vst [vmem:[%s2030_s2 + $0x18] sm:$0xff] %v469_v6  ;;  %v2320_v35 = vld [vmem:[#allocation8_spill] sm:$0xff] }
  0x6f   :  { %v471_v63 = vsel %vm2309_vm3, %v1719_v7, -1.0  ;;  %vm2310_vm4 = vnez %v2230_v14  ;;  %484 = vst [vmem:[%s2030_s2 + $0x10] sm:$0xff] %v468_v15  ;;  %v473_v45 = vsel %vm1600_vm11, %v1727_v43, -1.0  ;;  %v474_v44 = vsel %vm1606_vm7, %v1733_v17, -1.0  ;;  %486 = vst [vmem:[%s2030_s2 + $0x20] sm:$0xff] %v470_v20  ;;  %v2324_v15 = vld [vmem:[#allocation10_spill] sm:$0xff] }
  0x70   :  { %v472_v41 = vsel %vm2310_vm4, %v1723_v51, -1.0  ;;  %vm2311_vm14 = vnez %v2243_v47  ;;  %vm2312_vm5 = vnez %v2246_v10  ;;  %487 = vst [vmem:[%s2030_s2 + $0x28] sm:$0xff] %v471_v63  ;;  %v477_v59 = vsel %vm1646_vm10, %v1745_v61, -1.0  ;;  %489 = vst [vmem:[%s2030_s2 + $0x38] sm:$0xff] %v473_v45  ;;  %v2326_v20 = vld [vmem:[#allocation11_spill] sm:$0xff]  ;;  %v2332_v14 = vld [vmem:[#allocation24_spill] sm:$0xff] }
  0x71   :  { %v475_v55 = vsel %vm2311_vm14, %v1737_v53, -1.0  ;;  %v476_v62 = vsel %vm2312_vm5, %v1741_v34, -1.0  ;;  %488 = vst [vmem:[%s2030_s2 + $0x30] sm:$0xff] %v472_v41  ;;  %v478_v29 = vsel %vm1652_vm0, %v1749_v26, -1.0  ;;  %v479_v21 = vsel %vm1658_vm13, %v1757_v38, -1.0  ;;  %490 = vst [vmem:[%s2030_s2 + $0x40] sm:$0xff] %v474_v44 }
  0x72   :  { %v480_v19 = vsel %vm1664_vm1, %v1767_v11, -1.0  ;;  %491 = vst [vmem:[%s2030_s2 + $0x48] sm:$0xff] %v475_v55  ;;  %492 = vst [vmem:[%s2030_s2 + $0x50] sm:$0xff] %v476_v62  ;;  %v2313_v24 = vmov 0.0   ;;  %vm2315_vm6 = vnez %v2314_v49  ;;  %vm2317_vm15 = vnez %v2316_v57  ;;  %v2328_v41 = vld [vmem:[#allocation4_spill] sm:$0xff] }
  0x73   :  { %v1848_v42 = vsel %vm2315_vm6, 1.0, %v2313_v24  ;;  %v1853_v13 = vsel %vm2317_vm15, 1.0, %v2313_v24  ;;  %v685_v22 = vsel %vm2308_vm12, 1.0, %v2313_v24  ;;  %v481_v33 = vsel %vm1701_vm2, %v1771_v40, -1.0  ;;  %493 = vst [vmem:[%s2030_s2 + $0x58] sm:$0xff] %v477_v59  ;;  %494 = vst [vmem:[%s2030_s2 + $0x60] sm:$0xff] %v478_v29 }
  0x74   :  { %495 = vst [vmem:[%s2030_s2 + $0x68] sm:$0xff] %v479_v21  ;;  %496 = vst [vmem:[%s2030_s2 + $0x70] sm:$0xff] %v480_v19  ;;  %v453_v3 = vadd.f32 %v2319_v56, %v2318_v8  ;;  %v538_v25 = vadd.f32 %v2295_v9, %v2291_v58  ;;  %v562_v1 = vmul.f32 %v450_v27, %v1633_v37  ;;  %vm2321_vm8 = vnez %v2320_v35  ;;  %v2329_v62 = vld [vmem:[#allocation12_spill] sm:$0xff]  ;;  %v2331_v19 = vld [vmem:[#allocation5_spill] sm:$0xff] }
  0x75   :  { %497 = vst [vmem:[%s2030_s2 + $0x78] sm:$0xff] %v481_v33  ;;  %v563_v31 = vmul.f32 %v451_v39, %v1642_v12  ;;  %v1885_v28 = vsel %vm2321_vm8, 1.0, %v2313_v24  ;;  %vm2323_vm9 = vnez %v2322_v54  ;;  %vm2325_vm12 = vnez %v2324_v15  ;;  %v2334_v54 = vld [vmem:[#allocation30_spill] sm:$0xff] }
  0x76   :  { %v1890_v32 = vsel %vm2323_vm9, 1.0, %v2313_v24  ;;  %v1895_v5 = vsel %vm2325_vm12, 1.0, %v2313_v24  ;;  %v686_v6 = vsel %vm2309_vm3, 1.0, %v2313_v24  ;;  %vm2327_vm6 = vnez %v2326_v20 }
  0x77   :  { %v1903_v63 = vsel %vm2327_vm6, 1.0, %v2313_v24  ;;  %v454_v45 = vadd.f32 %v685_v22, %v2328_v41  ;;  %v539_v44 = vadd.f32 %v2297_v46, %v538_v25  ;;  %v564_v55 = vmul.f32 %v1763_v18, %v1679_v50 }
  0x78   :  { %vm2330_vm15 = vnez %v2329_v62  ;;  %v687_v4 = vsel %vm2310_vm4, 1.0, %v2313_v24  ;;  %v688_v29 = vsel %vm1600_vm11, 1.0, %v2313_v24  ;;  %v499_v21 = vmul.f32 %v2295_v9, %v1642_v12 }
  0x79   :  { %v1912_v59 = vsel %vm2330_vm15, 1.0, %v2313_v24  ;;  %v455_v49 = vadd.f32 %v686_v6, %v2331_v19  ;;  %v540_v57 = vadd.f32 %v2318_v8, %v539_v44  ;;  %v565_v22 = vmul.f32 %v453_v3, %v1688_v0 }
  0x7a   :  { %v578_v33 = vadd.f32 %v563_v31, %v562_v1  ;;  %v500_v56 = vmul.f32 %v2297_v46, %v1679_v50  ;;  %v602_v25 = vadd.f32 %v451_v39, %v450_v27  ;;  %vm2333_vm3 = vnez %v2332_v14  ;;  %v2335_v39 = vld [vmem:[#allocation13_spill] sm:$0xff]  ;;  %v2337_v1 = vld [vmem:[#allocation31_spill] sm:$0xff] }
  0x7b   :  { %v466_v35 = vsel %vm2333_vm3, %v1633_v37, -1.0  ;;  %v498_v16 = vmul.f32 %v2291_v58, %v1633_v37  ;;  %v456_v12 = vadd.f32 %v687_v4, %v2334_v54  ;;  %v541_v9 = vadd.f32 %v2328_v41, %v540_v57 }
  0x7c   :  { %v566_v15 = vmul.f32 %v454_v45, %v1697_v2  ;;  %v579_v6 = vadd.f32 %v578_v33, %v564_v55  ;;  %482 = vst [vmem:[%s2030_s2] sm:$0xff] %v466_v35  ;;  %v689_v50 = vsel %vm1606_vm7, 1.0, %v2313_v24  ;;  %v501_v27 = vmul.f32 %v2318_v8, %v1688_v0 }
  0x7d   :  { %v603_v37 = vadd.f32 %v602_v25, %v1763_v18  ;;  %v514_v58 = vadd.f32 %v499_v21, %v498_v16  ;;  %vm2336_vm11 = vnez %v2335_v39  ;;  %v457_v31 = vadd.f32 %v688_v29, %v2337_v1 }
  0x7e   :  { %v1947_v46 = vsel %vm2336_vm11, 1.0, %v2313_v24  ;;  %v567_v20 = vmul.f32 %v455_v49, %v1719_v7  ;;  %v580_v44 = vadd.f32 %v579_v6, %v565_v22  ;;  %v690_v48 = vsel %vm2311_vm14, 1.0, %v2313_v24 }
  0x7f   :  { %v604_v55 = vadd.f32 %v603_v37, %v453_v3  ;;  %v515_v62 = vadd.f32 %v514_v58, %v500_v56  ;;  %v502_v0 = vmul.f32 %v2328_v41, %v1697_v2  ;;  %v458_v18 = vadd.f32 %v689_v50, %v1848_v42 }
  0x80   :  { %v568_v8 = vmul.f32 %v456_v12, %v1723_v51  ;;  %v581_v4 = vadd.f32 %v580_v44, %v566_v15  ;;  %v542_v21 = vadd.f32 %v2331_v19, %v541_v9  ;;  %v691_v29 = vsel %vm2312_vm5, 1.0, %v2313_v24 }
  0x81   :  { %v516_v57 = vadd.f32 %v515_v62, %v501_v27  ;;  %v503_v47 = vmul.f32 %v2331_v19, %v1719_v7  ;;  %v605_v3 = vadd.f32 %v604_v55, %v454_v45  ;;  %v459_v22 = vadd.f32 %v690_v48, %v1853_v13 }
  0x82   :  { %v569_v2 = vmul.f32 %v457_v31, %v1727_v43  ;;  %v582_v41 = vadd.f32 %v581_v4, %v567_v20  ;;  %v543_v33 = vadd.f32 %v2334_v54, %v542_v21  ;;  %v692_v56 = vsel %vm1646_vm10, 1.0, %v2313_v24 }
  0x83   :  { %v504_v10 = vmul.f32 %v2334_v54, %v1723_v51  ;;  %v517_v25 = vadd.f32 %v516_v57, %v502_v0  ;;  %v606_v14 = vadd.f32 %v605_v3, %v455_v49  ;;  %v460_v35 = vadd.f32 %v691_v29, %v1885_v28 }
  0x84   :  { %v570_v7 = vmul.f32 %v458_v18, %v1733_v17  ;;  %v583_v45 = vadd.f32 %v582_v41, %v568_v8  ;;  %v544_v19 = vadd.f32 %v2337_v1, %v543_v33  ;;  %v693_v16 = vsel %vm1652_vm0, 1.0, %v2313_v24 }
  0x85   :  { %v505_v60 = vmul.f32 %v2337_v1, %v1727_v43  ;;  %v518_v9 = vadd.f32 %v517_v25, %v503_v47  ;;  %v607_v15 = vadd.f32 %v606_v14, %v456_v12  ;;  %v461_v51 = vadd.f32 %v692_v56, %v1890_v32 }
  0x86   :  { %v571_v49 = vmul.f32 %v459_v22, %v1737_v53  ;;  %v584_v54 = vadd.f32 %v583_v45, %v569_v2  ;;  %v545_v6 = vadd.f32 %v1848_v42, %v544_v19  ;;  %v694_v50 = vsel %vm1658_vm13, 1.0, %v2313_v24 }
  0x87   :  { %v506_v36 = vmul.f32 %v1848_v42, %v1733_v17  ;;  %v519_v27 = vadd.f32 %v518_v9, %v504_v10  ;;  %v608_v37 = vadd.f32 %v607_v15, %v457_v31  ;;  %v462_v43 = vadd.f32 %v693_v16, %v1895_v5 }
  0x88   :  { %v572_v12 = vmul.f32 %v460_v35, %v1741_v34  ;;  %v585_v58 = vadd.f32 %v584_v54, %v570_v7  ;;  %v546_v39 = vadd.f32 %v1853_v13, %v545_v6  ;;  %v695_v1 = vsel %vm1664_vm1, 1.0, %v2313_v24 }
  0x89   :  { %v507_v23 = vmul.f32 %v1853_v13, %v1737_v53  ;;  %v520_v20 = vadd.f32 %v519_v27, %v505_v60  ;;  %v609_v44 = vadd.f32 %v608_v37, %v458_v18  ;;  %v463_v17 = vadd.f32 %v694_v50, %v1903_v63 }
  0x8a   :  { %v573_v42 = vmul.f32 %v461_v51, %v1745_v61  ;;  %v586_v31 = vadd.f32 %v585_v58, %v571_v49  ;;  %v547_v48 = vadd.f32 %v1885_v28, %v546_v39  ;;  %v696_v55 = vsel %vm1701_vm2, 1.0, %v2313_v24 }
  0x8b   :  { %v508_v52 = vmul.f32 %v1885_v28, %v1741_v34  ;;  %v521_v62 = vadd.f32 %v520_v20, %v506_v36  ;;  %v610_v0 = vadd.f32 %v609_v44, %v459_v22  ;;  %v464_v53 = vadd.f32 %v695_v1, %v1912_v59 }
  0x8c   :  { %v574_v13 = vmul.f32 %v462_v43, %v1749_v26  ;;  %v587_v18 = vadd.f32 %v586_v31, %v572_v12  ;;  %v548_v8 = vadd.f32 %v1890_v32, %v547_v48  ;;  %v509_v4 = vmul.f32 %v1890_v32, %v1745_v61 }
  0x8d   :  { %v522_v21 = vadd.f32 %v521_v62, %v507_v23  ;;  %v611_v29 = vadd.f32 %v610_v0, %v460_v35  ;;  %v465_v30 = vadd.f32 %v696_v55, %v1947_v46  ;;  %v575_v24 = vmul.f32 %v463_v17, %v1757_v38 }
  0x8e   :  { %v588_v57 = vadd.f32 %v587_v18, %v573_v42  ;;  %v510_v34 = vmul.f32 %v1895_v5, %v1749_v26  ;;  %v549_v3 = vadd.f32 %v1895_v5, %v548_v8  ;;  %v576_v22 = vmul.f32 %v464_v53, %v1767_v11 }
  0x8f   :  { %v523_v28 = vadd.f32 %v522_v21, %v508_v52  ;;  %v612_v47 = vadd.f32 %v611_v29, %v461_v51  ;;  %v511_v61 = vmul.f32 %v1903_v63, %v1757_v38  ;;  %v577_v33 = vmul.f32 %v465_v30, %v1771_v40 }
  0x90   :  { %v589_v2 = vadd.f32 %v588_v57, %v574_v13  ;;  %v512_v10 = vmul.f32 %v1912_v59, %v1767_v11  ;;  %v550_v14 = vadd.f32 %v1903_v63, %v549_v3  ;;  %v513_v5 = vmul.f32 %v1947_v46, %v1771_v40 }
  0x91   :  { %v524_v32 = vadd.f32 %v523_v28, %v509_v4  ;;  %v613_v41 = vadd.f32 %v612_v47, %v462_v43  ;;  %v626_v0 = vlaneseq }
  0x92   :  { %v590_v56 = vadd.f32 %v589_v2, %v575_v24  ;;  %v551_v16 = vadd.f32 %v1912_v59, %v550_v14 }
  0x93   :  { %v525_v25 = vadd.f32 %v524_v32, %v510_v34  ;;  %v614_v26 = vadd.f32 %v613_v41, %v463_v17 }
  0x94   :  { %v591_v35 = vadd.f32 %v590_v56, %v576_v22  ;;  %v552_v11 = vadd.f32 %v1947_v46, %v551_v16 }
  0x95   :  { %v526_v7 = vadd.f32 %v525_v25, %v511_v61  ;;  %v615_v45 = vadd.f32 %v614_v26, %v464_v53  ;;  %v627_v53 = vshrl.u32 %v626_v0, 7 }
  0x96   :  { %v592_v19 = vadd.f32 %v591_v35, %v577_v33 }
  0x97   :  { %v527_v38 = vadd.f32 %v526_v7, %v512_v10  ;;  %v616_v60 = vadd.f32 %v615_v45, %v465_v30  ;;  %vm631_vm13 = vcmp.eq.s32.totalorder %v627_v53, 3  ;;  %vm630_vm7 = vcmp.eq.s32.totalorder %v627_v53, 2 }
  0x98   :  { %593 = vadd.xlane.f32.xlu1 %v592_v19  ;;  %vm629_vm10 = vcmp.eq.s32.totalorder %v627_v53, 1  ;;  %vm628_vm0 = vcmp.eq.s32.totalorder %v627_v53, 0 }
  0x99   :  { %v528_v9 = vadd.f32 %v527_v38, %v513_v5 }
  0x9b   :  { %529 = vadd.xlane.f32.xlu0 %v528_v9 }
  0x9c   :  { %617 = vadd.xlane.f32.xlu1 %v616_v60 }
  0x9f   :  { %553 = vadd.xlane.f32.xlu0 %v552_v11 }
 0x125   :  { %v594_v15 = vpop.xlane.xlu1 %593 }
 0x126   :  { %v595_v63 = vrot.slane %v594_v15, 4 }
 0x128   :  { %v596_v51 = vadd.f32 %v595_v63, %v594_v15  ;;  %v530_v49 = vpop.xlane.xlu0 %529 }
 0x129   :  { %v531_v54 = vrot.slane %v530_v49, 4  ;;  %v618_v40 = vpop.xlane.xlu1 %617 }
 0x12a   :  { %v619_v6 = vrot.slane %v618_v40, 4  ;;  %v597_v36 = vrot.slane %v596_v51, 2 }
 0x12b   :  { %v532_v50 = vadd.f32 %v531_v54, %v530_v49 }
 0x12c   :  { %v620_v27 = vadd.f32 %v619_v6, %v618_v40  ;;  %v554_v37 = vpop.xlane.xlu0 %553  ;;  %v598_v46 = vadd.f32 %v597_v36, %v596_v51 }
 0x12d   :  { %v533_v59 = vrot.slane %v532_v50, 2  ;;  %v555_v43 = vrot.slane %v554_v37, 4 }
 0x12e   :  { %v621_v12 = vrot.slane %v620_v27, 2  ;;  %v599_v31 = vrot.slane %v598_v46, 1 }
 0x12f   :  { %v556_v58 = vadd.f32 %v555_v43, %v554_v37  ;;  %v534_v39 = vadd.f32 %v533_v59, %v532_v50 }
 0x130   :  { %v622_v1 = vadd.f32 %v621_v12, %v620_v27  ;;  %v600_v62 = vadd.f32 %v599_v31, %v598_v46 }
 0x131   :  { %v557_v23 = vrot.slane %v556_v58, 2  ;;  %v535_v20 = vrot.slane %v534_v39, 1 }
 0x132   :  { %v623_v42 = vrot.slane %v622_v1, 1 }
 0x133   :  { %v558_v44 = vadd.f32 %v557_v23, %v556_v58  ;;  %v536_v17 = vadd.f32 %v535_v20, %v534_v39 }
 0x134   :  { %v624_v52 = vadd.f32 %v623_v42, %v622_v1 }
 0x135   :  { %697 = vpush %v536_v17  ;;  %v559_v48 = vrot.slane %v558_v44, 1 }
 0x137   :  { %v560_v55 = vadd.f32 %v559_v48, %v558_v44 }
 0x139   :  { %699 = vpush %v560_v55 }
 0x13a   :  { %701 = vpush %v600_v62 }
 0x13b   :  { %703 = vpush %v624_v52 }
 0x166   :  { %s698_s2 = spop %697 }
 0x167   :  { %v638_v29 = vstv %s698_s2 }
 0x16a   :  { %s700_s4 = spop %699 }
 0x16b   :  { %s702_s5 = spop %701  ;;  %v636_v4 = vstv %s700_s4 }
 0x16c   :  { %v634_v13 = vstv %s702_s5  ;;  %s704_s6 = spop %703 }
 0x16d   :  { %v632_v18 = vstv %s704_s6 }
 0x16e   :  { %v633_v8 = vsel %vm631_vm13, %v632_v18, 0.0 }
 0x16f   :  { %v635_v21 = vsel %vm630_vm7, %v634_v13, %v633_v8 }
 0x170   :  { %v637_v30 = vsel %vm629_vm10, %v636_v4, %v635_v21 }
 0x171   :  { %v639_v24 = vsel %vm628_vm0, %v638_v29, %v637_v30 }
 0x172   :  { %640 = vst [vmem:[%s2031_s3] sm:$0xff] %v639_v24 }

</bundles_post_ra>
